<compile_context>
chip_gen: v5e
topology: v5e:2x2
jax: 0.10.0
libtpu: 0.0.40
codegen_flags: <defaults>
</compile_context>

<pallas_src>
import jax
import jax.numpy as jnp
from jax.experimental import pallas as pl
from jax.experimental.pallas import tpu as pltpu


def _tv_loss_kernel(x_ref, h_out_ref, w_out_ref):
    # x_ref block: (TB, H, W) in native dtype; do the math in f32 on the VPU.
    x = x_ref[...].astype(jnp.float32)

    dh = x[:, 1:, :] - x[:, :-1, :]          # (TB, H-1, W)
    dw = x[:, :, 1:] - x[:, :, :-1]          # (TB, H,   W-1)

    h_sq = dh * dh
    w_sq = dw * dw

    # Reduce batch axis (VPU adds) then sublane axis (XLU); keep lanes dense.
    # The final cross-lane reduce is deferred to the wrapper.
    h_part = jnp.sum(jnp.sum(h_sq, axis=0, keepdims=True), axis=1, keepdims=True)
    w_part = jnp.sum(jnp.sum(w_sq, axis=0, keepdims=True), axis=1, keepdims=True)

    h_out_ref[...] = h_part                  # (1, 1, W)
    w_out_ref[...] = w_part                  # (1, 1, W-1)


def tv_loss(x, tv_loss_weight=1.0):
    """Pallas TPU implementation of TVLossTmp.forward for x of shape [B, H, W]."""
    B, H, W = x.shape
    if H < 2 or W < 2:
        # The PyTorch reference divides by zero in this case anyway.
        raise ValueError("tv_loss requires H >= 2 and W >= 2")

    count_h = (H - 1) * W
    count_w = H * (W - 1)

    # Batch tile: target ~512K elements (~2 MiB f32) per block so the DMA is in
    # the bandwidth sweet spot while intermediates stay well inside VMEM on all
    # generations (v5e/v6e/v7x) with the raised scoped limit below.
    target_elems = 512 * 1024
    tb = max(1, min(B, target_elems // (H * W)))
    # TODO(synk): add an H-tiling grid axis (with seam handling for the h-diff)
    # for frames so large that a single (1, H, W) image exceeds the per-buffer
    # VMEM budget (mandatory on v7x's 64 MiB VMEM for e.g. 4096x4096 f32).
    nb = pl.cdiv(B, tb)

    # Pad the batch with zero images; a zero image contributes exactly 0 to
    # both h_tv and w_tv (diffs are strictly within-image), and we divide by
    # the original B below, so padding is semantics-preserving.
    pad_b = nb * tb - B
    if pad_b:
        x = jnp.pad(x, ((0, pad_b), (0, 0), (0, 0)))

    h_parts, w_parts = pl.pallas_call(
        _tv_loss_kernel,
        out_shape=(
            jax.ShapeDtypeStruct((nb, 1, W), jnp.float32),
            jax.ShapeDtypeStruct((nb, 1, W - 1), jnp.float32),
        ),
        grid=(nb,),
        in_specs=[pl.BlockSpec((tb, H, W), lambda i: (i, 0, 0))],
        out_specs=(
            pl.BlockSpec((1, 1, W), lambda i: (i, 0, 0)),
            pl.BlockSpec((1, 1, W - 1), lambda i: (i, 0, 0)),
        ),
        compiler_params=pltpu.CompilerParams(
            dimension_semantics=("parallel",),      # independent blocks -> megacore on v7x
            vmem_limit_bytes=48 * 1024 * 1024,
        ),
        cost_estimate=pl.CostEstimate(
            flops=int((B + pad_b) * (3 * (H - 1) * W + 3 * H * (W - 1))),
            transcendentals=0,
            bytes_accessed=int(x.size * x.dtype.itemsize
                               + 4 * nb * (W + (W - 1))),
        ),
    )(x)

    # Final (tiny) cross-lane / cross-block reduce and scaling in plain JAX.
    h_tv = jnp.sum(h_parts)
    w_tv = jnp.sum(w_parts)
    return tv_loss_weight * 2.0 * (h_tv / count_h + w_tv / count_w) / B


# ---------------- pure-JAX reference (mirrors the PyTorch module) ------------
def _tv_loss_ref(x, tv_loss_weight=1.0):
    x = x.astype(jnp.float32)
    B, H, W = x.shape
    count_h = (H - 1) * W
    count_w = H * (W - 1)
    h_tv = jnp.sum((x[:, 1:, :] - x[:, :H - 1, :]) ** 2)
    w_tv = jnp.sum((x[:, :, 1:] - x[:, :, :W - 1]) ** 2)
    return tv_loss_weight * 2.0 * (h_tv / count_h + w_tv / count_w) / B


if __name__ == "__main__":
    key = jax.random.PRNGKey(0)

    B, H, W = 2, 16, 16          # small shapes consistent with the module
    weight = 1.0

    x = jax.random.normal(key, (B, H, W), jnp.float32)

    loss = tv_loss(x, weight)
    jax.block_until_ready(loss)

    ref = _tv_loss_ref(x, weight)
    assert jnp.allclose(loss, ref, atol=1e-5, rtol=1e-5), (loss, ref)

    # Also exercise a case where the batch tile does not divide B (padding path).
    x2 = jax.random.normal(jax.random.PRNGKey(1), (3, 16, 16), jnp.float32)
    loss2 = tv_loss(x2, 0.5)
    jax.block_until_ready(loss2)
    ref2 = _tv_loss_ref(x2, 0.5)
    assert jnp.allclose(loss2, ref2, atol=1e-5, rtol=1e-5), (loss2, ref2)

    print("KERNEL_OK")
</pallas_src>

<mosaic_0001>
module attributes {stable_mosaic.version = 11 : i64} {
  func.func @_tv_loss_kernel(%arg0: i32, %arg1: memref<2x16x16xf32, #tpu.memory_space<vmem>>, %arg2: memref<1x1x16xf32, #tpu.memory_space<vmem>>, %arg3: memref<1x1x15xf32, #tpu.memory_space<vmem>>) attributes {dimension_semantics = [#tpu.dimension_semantics<parallel>], iteration_bounds = array<i64: 1>, scalar_prefetch = 0 : i64, scratch_operands = 0 : i64, tpu.core_type = #tpu.core_type<tc>, window_params = [{transform_indices = @transform_0, window_bounds = array<i64: 2, 16, 16>}, {transform_indices = @transform_1, window_bounds = array<i64: 1, 1, 16>}, {transform_indices = @transform_2, window_bounds = array<i64: 1, 1, 15>}]} {
    %c0 = arith.constant 0 : index
    %c0_0 = arith.constant 0 : index
    %c0_1 = arith.constant 0 : index
    %0 = vector.load %arg1[%c0, %c0_0, %c0_1] : memref<2x16x16xf32, #tpu.memory_space<vmem>>, vector<2x16x16xf32>
    %1 = vector.extract_strided_slice %0 {offsets = [0, 1, 0], sizes = [2, 15, 16], strides = [1, 1, 1]} : vector<2x16x16xf32> to vector<2x15x16xf32>
    %2 = vector.extract_strided_slice %0 {offsets = [0, 0, 0], sizes = [2, 15, 16], strides = [1, 1, 1]} : vector<2x16x16xf32> to vector<2x15x16xf32>
    %3 = arith.subf %1, %2 : vector<2x15x16xf32>
    %4 = vector.extract_strided_slice %0 {offsets = [0, 0, 1], sizes = [2, 16, 15], strides = [1, 1, 1]} : vector<2x16x16xf32> to vector<2x16x15xf32>
    %5 = vector.extract_strided_slice %0 {offsets = [0, 0, 0], sizes = [2, 16, 15], strides = [1, 1, 1]} : vector<2x16x16xf32> to vector<2x16x15xf32>
    %6 = arith.subf %4, %5 : vector<2x16x15xf32>
    %7 = arith.mulf %3, %3 : vector<2x15x16xf32>
    %8 = arith.mulf %6, %6 : vector<2x16x15xf32>
    %cst = arith.constant dense<0.000000e+00> : vector<15x16xf32>
    %9 = vector.multi_reduction <add>, %7, %cst [0] : vector<2x15x16xf32> to vector<15x16xf32>
    %10 = vector.shape_cast %9 : vector<15x16xf32> to vector<1x15x16xf32>
    %cst_2 = arith.constant dense<0.000000e+00> : vector<1x16xf32>
    %11 = vector.multi_reduction <add>, %10, %cst_2 [1] : vector<1x15x16xf32> to vector<1x16xf32>
    %12 = vector.shape_cast %11 : vector<1x16xf32> to vector<1x1x16xf32>
    %cst_3 = arith.constant dense<0.000000e+00> : vector<16x15xf32>
    %13 = vector.multi_reduction <add>, %8, %cst_3 [0] : vector<2x16x15xf32> to vector<16x15xf32>
    %14 = vector.shape_cast %13 : vector<16x15xf32> to vector<1x16x15xf32>
    %cst_4 = arith.constant dense<0.000000e+00> : vector<1x15xf32>
    %15 = vector.multi_reduction <add>, %14, %cst_4 [1] : vector<1x16x15xf32> to vector<1x15xf32>
    %16 = vector.shape_cast %15 : vector<1x15xf32> to vector<1x1x15xf32>
    %c0_5 = arith.constant 0 : index
    %c0_6 = arith.constant 0 : index
    %c0_7 = arith.constant 0 : index
    %17 = vector.load %arg2[%c0_5, %c0_6, %c0_7] : memref<1x1x16xf32, #tpu.memory_space<vmem>>, vector<1x1x16xf32>
    tpu.vector_store %arg2[%c0_5, %c0_6, %c0_7], %12 {strides = array<i32>} : memref<1x1x16xf32, #tpu.memory_space<vmem>>, vector<1x1x16xf32>,
    %c0_8 = arith.constant 0 : index
    %c0_9 = arith.constant 0 : index
    %c0_10 = arith.constant 0 : index
    %18 = vector.load %arg3[%c0_8, %c0_9, %c0_10] : memref<1x1x15xf32, #tpu.memory_space<vmem>>, vector<1x1x15xf32>
    tpu.vector_store %arg3[%c0_8, %c0_9, %c0_10], %16 {strides = array<i32>} : memref<1x1x15xf32, #tpu.memory_space<vmem>>, vector<1x1x15xf32>,
    return
  }
  func.func @transform_0(%arg0: i32) -> (i32, i32, i32) {
    %c0_i32 = arith.constant 0 : i32
    %c0_i32_0 = arith.constant 0 : i32
    %c0_i32_1 = arith.constant 0 : i32
    return %arg0, %c0_i32, %c0_i32_0 : i32, i32, i32
  }
  func.func @transform_1(%arg0: i32) -> (i32, i32, i32) {
    %c0_i32 = arith.constant 0 : i32
    %c0_i32_0 = arith.constant 0 : i32
    %c0_i32_1 = arith.constant 0 : i32
    return %arg0, %c0_i32, %c0_i32_0 : i32, i32, i32
  }
  func.func @transform_2(%arg0: i32) -> (i32, i32, i32) {
    %c0_i32 = arith.constant 0 : i32
    %c0_i32_0 = arith.constant 0 : i32
    %c0_i32_1 = arith.constant 0 : i32
    return %arg0, %c0_i32, %c0_i32_0 : i32, i32, i32
  }
}

</mosaic_0001>

<bundles_post_ra>
// kernel: tpu_custom_call.1
= control target key start
LH: loop header
LB: loop body
LE: loop exit
PB: predicated region body
PF: predicated region fallthrough
CT: control target
= control target key end

     0   :  { %8 = vsyncpa [#allocation3], 0  ;;  %s274_s0 = inlined_call_operand.hbm [shape: f32[2,16,16], index: 0, kind: input, shape index: {}]   ;;  %s275_s1 = inlined_call_operand.hbm [shape: f32[1,1,16], index: 1, kind: output, shape index: {0}]   ;;  %s276_s2 = inlined_call_operand.hbm [shape: f32[1,1,15], index: 2, kind: output, shape index: {1}]  }
   0x1   :  { %9 = vsyncpa [#allocation4], 0 }
   0x2   :  { %10 = vsyncpa [#allocation7], 0  ;;  %s15_s11 = sshll.u32 %s274_s0, 4  ;;  %s243_s12 = smov [#allocation2]   ;;  %s16_s11 = int_to_ptr.hbm [resolvable:$true] %s15_s11 }
   0x3   :  { %s17_s13 = sshll.u32 %s243_s12, 4  ;;  %s244_s14 = smov 128   ;;  %s18_s13 = int_to_ptr.vmem [resolvable:$true] %s17_s13 }
   0x4   :  { %s245_s15 = smov 8  }
   0x5   :  { %23 = dma.hbm_to_vmem [thread:$0]  %s16_s11, 512, %s18_s13, [#allocation3], %s244_s14, %s244_s14, %s245_s15  }
   0x6   :  { %237 = dma.done.wait [#allocation3], 512  }
   0x7   :  { %238 = vsyncadd [#allocation3], 4294966784  ;;  %v30_v0 = vld [vmem:[#allocation2 + $0x10] sm:$0xff]  ;;  %v28_v1 = vld [vmem:[#allocation2] sm:$0xff]  ;;  %s246_s16 = smov 1   ;;  %vm101_vm0 = vcmask 130056  }
   0x8   :  { %55 = vrot.lane.b32.xlu1 %v30_v0, %s246_s16  ;;  %51 = vrot.lane.b32.xlu0 %v28_v1, %s246_s16  ;;  %v31_v2 = vld [vmem:[#allocation2 + $0x18] sm:$0xff]  ;;  %v29_v3 = vld [vmem:[#allocation2 + $0x8] sm:$0xff]  ;;  %s247_s0 = smov 127   ;;  %v40_v31 = vrot.slane %v30_v0, 7  ;;  %v37_v32 = vrot.slane %v28_v1, 7  ;;  %vm36_vm1 = vcmask 1040384  }
   0x9   :  { %v41_v33 = vrot.slane %v31_v2, 7  ;;  %v38_v34 = vrot.slane %v29_v3, 7  ;;  %vm79_vm2 = vcmask 130048   ;;  %vm75_vm3 = vcmask 130049   ;;  %s248_s17 = smov [#allocation5]   ;;  %s132_s21 = sshll.u32 %s275_s1, 4  ;;  %s133_s21 = int_to_ptr.hbm [resolvable:$true] %s132_s21 }
   0xa   :  { %v49_v39 = vsub.f32 %v30_v0, %v40_v31  ;;  %v47_v40 = vsub.f32 %v28_v1, %v37_v32  ;;  %vm92_vm4 = vcmask 129024   ;;  %vm85_vm5 = vcmask 1046528   ;;  %s130_s18 = sshll.u32 %s248_s17, 4  ;;  %s249_s22 = smov [#allocation6]   ;;  %s131_s18 = int_to_ptr.vmem [resolvable:$true] %s130_s18 }
   0xb   :  { %v42_v35 = vsel %vm36_vm1, %v40_v31, %v41_v33  ;;  %v39_v36 = vsel %vm36_vm1, %v37_v32, %v38_v34  ;;  %vm117_vm6 = vcmask 122880   ;;  %s141_s23 = sshll.u32 %s249_s22, 4  ;;  %s143_s26 = sshll.u32 %s276_s2, 4  ;;  %vm123_vm7 = vcmask 114688   ;;  %s142_s23 = int_to_ptr.vmem [resolvable:$true] %s141_s23  ;;  %s144_s26 = int_to_ptr.hbm [resolvable:$true] %s143_s26 }
   0xc   :  { %v50_v37 = vsub.f32 %v31_v2, %v42_v35  ;;  %v48_v38 = vsub.f32 %v29_v3, %v39_v36  ;;  %v69_v43 = vmul.f32 %v49_v39, %v49_v39  ;;  %v67_v44 = vmul.f32 %v47_v40, %v47_v40 }
   0xe   :  { %v70_v41 = vmul.f32 %v50_v37, %v50_v37  ;;  %v68_v42 = vmul.f32 %v48_v38, %v48_v38  ;;  %v77_v47 = vsel %vm75_vm3, %v69_v43, 0.0  ;;  %v76_v48 = vsel %vm75_vm3, %v67_v44, 0.0 }
   0xf   :  { %v78_v50 = vadd.f32 %v77_v47, %v76_v48 }
  0x10   :  { %57 = vrot.lane.b32.xlu1 %v31_v2, %s246_s16  ;;  %53 = vrot.lane.b32.xlu0 %v29_v3, %s246_s16  ;;  %v81_v45 = vsel %vm79_vm2, %v70_v41, 0.0  ;;  %v80_v46 = vsel %vm79_vm2, %v68_v42, 0.0 }
  0x11   :  { %v82_v49 = vadd.f32 %v81_v45, %v80_v46  ;;  %v86_v52 = vrot.slane %v78_v50, 1 }
  0x13   :  { %v87_v51 = vrot.slane %v82_v49, 1 }
  0x15   :  { %v93_v53 = vsel %vm92_vm4, %v87_v51, 0.0  ;;  %v88_v54 = vsel %vm85_vm5, %v86_v52, %v87_v51 }
  0x16   :  { %v91_v55 = vsel %vm79_vm2, %v88_v54, 0.0 }
  0x17   :  { %v94_v56 = vadd.f32 %v93_v53, %v91_v55 }
  0x19   :  { %v95_v57 = vrot.slane %v94_v56, 4 }
  0x1b   :  { %v96_v58 = vadd.f32 %v95_v57, %v94_v56 }
  0x1d   :  { %v97_v59 = vrot.slane %v96_v58, 2 }
  0x1f   :  { %v98_v60 = vadd.f32 %v97_v59, %v96_v58 }
  0x21   :  { %v99_v61 = vrot.slane %v98_v60, 1 }
  0x23   :  { %v100_v62 = vadd.f32 %v99_v61, %v98_v60 }
  0x25   :  { %118 = vst.msk [vmem:[#allocation5] sm:$0x1] %vm117_vm6, %v100_v62 }
  0x26   :  { %135 = dma.vmem_to_hbm [thread:$0]  %s131_s18, 16, %s133_s21, [#allocation4]  }
  0x7a   :  { %v56_v4 = vpop.permute.xlu1 %55  ;;  %v52_v5 = vpop.permute.xlu0 %51 }
  0x7b   :  { %v65_v6 = vsub.f32 %v30_v0, %v56_v4  ;;  %v63_v7 = vsub.f32 %v28_v1, %v52_v5 }
  0x7d   :  { %v73_v8 = vmul.f32 %v65_v6, %v65_v6  ;;  %v71_v9 = vmul.f32 %v63_v7, %v63_v7 }
  0x7f   :  { %v103_v12 = vsel %vm101_vm0, %v73_v8, 0.0  ;;  %v102_v13 = vsel %vm101_vm0, %v71_v9, 0.0 }
  0x80   :  { %v104_v18 = vadd.f32 %v103_v12, %v102_v13 }
  0x82   :  { %v58_v10 = vpop.permute.xlu1 %57  ;;  %v54_v11 = vpop.permute.xlu0 %53  ;;  %v108_v22 = vsel %vm101_vm0, %v104_v18, 0.0 }
  0x83   :  { %v66_v14 = vsub.f32 %v31_v2, %v58_v10  ;;  %v64_v15 = vsub.f32 %v29_v3, %v54_v11 }
  0x85   :  { %v74_v16 = vmul.f32 %v66_v14, %v66_v14  ;;  %v72_v17 = vmul.f32 %v64_v15, %v64_v15 }
  0x87   :  { %v106_v19 = vsel %vm101_vm0, %v74_v16, 0.0  ;;  %v105_v20 = vsel %vm101_vm0, %v72_v17, 0.0 }
  0x88   :  { %v107_v21 = vadd.f32 %v106_v19, %v105_v20 }
  0x8a   :  { %v109_v23 = vsel %vm101_vm0, %v107_v21, 0.0 }
  0x8b   :  { %v110_v24 = vadd.f32 %v109_v23, %v108_v22 }
  0x8d   :  { %v111_v25 = vrot.slane %v110_v24, 4 }
  0x8f   :  { %v112_v26 = vadd.f32 %v111_v25, %v110_v24 }
  0x91   :  { %v113_v27 = vrot.slane %v112_v26, 2 }
  0x93   :  { %v114_v28 = vadd.f32 %v113_v27, %v112_v26 }
  0x95   :  { %v115_v29 = vrot.slane %v114_v28, 1 }
  0x97   :  { %v116_v30 = vadd.f32 %v115_v29, %v114_v28 }
  0x99   :  { %120 = vrot.lane.b32.xlu2 %v116_v30, %s247_s0 }
  0xf3   :  { %v121_v63 = vpop.permute.xlu2 %120 }
  0xf4   :  { %124 = vst.msk [vmem:[#allocation6] sm:$0x1] %vm123_vm7, %v121_v63 }
  0xf5   :  { %146 = dma.vmem_to_hbm [thread:$0]  %s142_s23, 16, %s144_s26, [#allocation7]  }
  0xf6   :  { %239 = dma.done.wait [#allocation4], 16  }
  0xf7   :  { %240 = vsyncadd [#allocation4], 4294967280 }
  0xf8   :  { %241 = dma.done.wait [#allocation7], 16  }
  0xf9   :  { %242 = vsyncadd [#allocation7], 4294967280 }
  0xfa   :  { %155 = vsyncpa [#allocation3], 1 }
  0xfb   :  { %156 = vsyncpa [#allocation4], 1 }
  0xfc   :  { %157 = vsyncpa [#allocation7], 1 }

</bundles_post_ra>
